<compile_context>
chip_gen: v5e
topology: v5e:2x2
jax: 0.10.0
libtpu: 0.0.40
codegen_flags: <defaults>
</compile_context>

<pallas_src>
import jax
import jax.numpy as jnp
from jax.experimental import pallas as pl
from jax.experimental.pallas import tpu as pltpu


_VMEM_LIMIT_FLOOR = 32 * 1024 * 1024  # >= every generation's default scoped limit
_VMEM_LIMIT_CAP = 48 * 1024 * 1024    # conservative under v7x's 64 MiB physical VMEM


def _vmem_limit(needed_bytes: int) -> int:
    """Scoped-VMEM limit request: 2x working set + headroom, clamped."""
    return int(min(max(2 * needed_bytes + (2 << 20), _VMEM_LIMIT_FLOOR),
                   _VMEM_LIMIT_CAP))


# --------------------------------------------------------------------------
# Kernel bodies
# --------------------------------------------------------------------------

def _finish_layers(h, w_refs, b_refs):
    """h: f32 layer-0 pre-activation (bias already added). Runs layers 1..L.

    ReLU is applied after every layer except the classifier head; if there is
    only one layer (head only), no ReLU is applied at all.
    """
    n = len(w_refs)
    if n > 1:
        h = jnp.maximum(h, 0.0)                          # ReLU after layer 0
    for i in range(1, n):                                # unrolled at trace time
        h = jnp.dot(h.astype(w_refs[i].dtype), w_refs[i][...],
                    preferred_element_type=jnp.float32) + b_refs[i][...]
        if i != n - 1:
            h = jnp.maximum(h, 0.0)
    return h


def _mlp_single_block_kernel(*refs):
    """Grid-less fused MLP: everything resident in VMEM, single logits store.

    refs: x, w0, b0, w1, b1, ..., wL, bL, o_ref
    """
    x_ref, *param_refs, o_ref = refs
    w_refs = param_refs[0::2]
    b_refs = param_refs[1::2]
    h = jnp.dot(x_ref[...], w_refs[0][...],
                preferred_element_type=jnp.float32) + b_refs[0][...]
    o_ref[...] = _finish_layers(h, w_refs, b_refs).astype(o_ref.dtype)


def _mlp_ktiled_kernel(x_ref, *refs):
    """K-tiled fused MLP: layer 0 accumulates in an f32 VMEM scratch.

    refs: w0, b0, w1, b1, ..., wL, bL, o_ref, h_acc
      x_ref : (B, tk)      bf16  K-tile of flattened input
      w0    : (tk, d0)     bf16  K-tile of first-layer weight
      others: whole arrays (resident across the K grid)
      h_acc : (B, d0)      f32   layer-0 accumulator
    """
    *param_refs, o_ref, h_acc = refs
    w_refs = param_refs[0::2]
    b_refs = param_refs[1::2]
    k = pl.program_id(0)

    @pl.when(k == 0)
    def _init():
        h_acc[...] = jnp.zeros_like(h_acc)

    h_acc[...] += jnp.dot(x_ref[...], w_refs[0][...],
                          preferred_element_type=jnp.float32)

    @pl.when(k == pl.num_programs(0) - 1)
    def _finalize():
        h = h_acc[...] + b_refs[0][...]
        o_ref[...] = _finish_layers(h, w_refs, b_refs).astype(o_ref.dtype)


# --------------------------------------------------------------------------
# pallas_call wrappers
# --------------------------------------------------------------------------

def _single_block_call(x_flat, layers, ncls_pad, out_dtype):
    b = x_flat.shape[0]
    inputs = [x_flat]
    for w, bias in layers:
        inputs += [w, bias]
    needed = sum(int(a.size) * a.dtype.itemsize for a in inputs) + b * ncls_pad * 4
    return pl.pallas_call(
        _mlp_single_block_kernel,
        out_shape=jax.ShapeDtypeStruct((b, ncls_pad), out_dtype),
        compiler_params=pltpu.CompilerParams(vmem_limit_bytes=_vmem_limit(needed)),
    )(*inputs)


def _ktiled_call(x_flat, layers, ncls_pad, out_dtype, tk, w0_tile_bytes,
                 single_buffer_residents):
    b, k_in = x_flat.shape
    (w0, b0), rest = layers[0], layers[1:]
    d0 = w0.shape[1]
    itemsize = jnp.dtype(w0.dtype).itemsize

    # K tile from a byte budget (~w0_tile_bytes of W0 per tile): big enough to
    # amortize the ~0.35 us per-grid-step overhead against the HBM stream.
    if tk is None:
        tk = w0_tile_bytes // (d0 * itemsize)
    tk = max(256, (int(tk) // 256) * 256)
    tk = min(tk, pl.cdiv(k_in, 256) * 256)

    k_pad = pl.cdiv(k_in, tk) * tk
    if k_pad != k_in:                        # zero-pad K: does not change x @ W0
        x_flat = jnp.pad(x_flat, ((0, 0), (0, k_pad - k_in)))
        w0 = jnp.pad(w0, ((0, k_pad - k_in), (0, 0)))

    def resident_spec(shape):
        idx = lambda k, n=len(shape): (0,) * n
        if single_buffer_residents:
            # Block index never changes across the K grid -> double-buffering
            # these only wastes VMEM; single-buffer them.
            return pl.BlockSpec(shape, idx, pipeline_mode=pl.Buffered(1))
        return pl.BlockSpec(shape, idx)

    inputs = [x_flat, w0, b0]
    in_specs = [
        pl.BlockSpec((b, tk), lambda k: (0, k)),        # x : K-tiled
        pl.BlockSpec((tk, d0), lambda k: (k, 0)),       # W0: K-tiled
        resident_spec(b0.shape),
    ]
    for w, bias in rest:                                # small layers: resident
        in_specs += [resident_spec(w.shape), resident_spec(bias.shape)]
        inputs += [w, bias]

    resident_bytes = sum(int(a.size) * a.dtype.itemsize for a in inputs[2:])
    tile_bytes = (b * tk + tk * d0) * itemsize
    needed = (2 * tile_bytes                                    # double-buffered stream
              + (1 if single_buffer_residents else 2) * resident_bytes
              + b * d0 * 4 + b * ncls_pad * 4)                  # h_acc + logits

    return pl.pallas_call(
        _mlp_ktiled_kernel,
        out_shape=jax.ShapeDtypeStruct((b, ncls_pad), out_dtype),
        grid_spec=pltpu.PrefetchScalarGridSpec(
            num_scalar_prefetch=0,
            grid=(k_pad // tk,),
            in_specs=in_specs,
            out_specs=pl.BlockSpec((b, ncls_pad), lambda k: (0, 0)),
            scratch_shapes=[pltpu.VMEM((b, d0), jnp.float32)],
        ),
        compiler_params=pltpu.CompilerParams(
            dimension_semantics=("arbitrary",),         # K is a reduction axis
            vmem_limit_bytes=_vmem_limit(needed),
        ),
    )(*inputs)


def fused_mlp_forward(x, params, *, out_dtype=jnp.float32,
                      fast_path_max_bytes=4 * 1024 * 1024,
                      w0_tile_bytes=4 * 1024 * 1024,
                      tk=None, force_tiled=False):
    """x: (b, 3, H, W) -> logits (b, num_classes). One pallas_call total.

    params: list of (W, b) with W stored (in_features, out_features) (torch
            weight.T) and b stored (1, out_features); last entry is the head.
    """
    b = x.shape[0]
    compute_dtype = params[0][0].dtype
    # Cast before any padding: one pass over x, half the bytes of an f32 pad.
    x_flat = x.reshape(b, -1).astype(compute_dtype)     # == torch x.view(b, -1)
    k_in = x_flat.shape[1]
    num_classes = params[-1][0].shape[1]

    # Pad the classifier head to a 128-lane width so the single logits store
    # is an unmasked vst; wrapper slices back to num_classes afterwards.
    ncls_pad = pl.cdiv(num_classes, 128) * 128
    head_w, head_b = params[-1]
    if ncls_pad != num_classes:
        head_w = jnp.pad(head_w, ((0, 0), (0, ncls_pad - num_classes)))
        head_b = jnp.pad(head_b, ((0, 0), (0, ncls_pad - num_classes)))
    layers = list(params[:-1]) + [(head_w, head_b)]

    itemsize = jnp.dtype(compute_dtype).itemsize
    stream_bytes = (b * k_in + k_in * layers[0][0].shape[1]) * itemsize

    if force_tiled or stream_bytes > fast_path_max_bytes:
        try:
            out = _ktiled_call(x_flat, layers, ncls_pad, out_dtype,
                               tk, w0_tile_bytes, single_buffer_residents=True)
        except Exception:
            # pl.Buffered(1) not supported by this jax/Mosaic build ->
            # fall back to default (double-buffered) resident params.
            out = _ktiled_call(x_flat, layers, ncls_pad, out_dtype,
                               tk, w0_tile_bytes, single_buffer_residents=False)
    else:
        out = _single_block_call(x_flat, layers, ncls_pad, out_dtype)
    return out[:, :num_classes]


# --------------------------------------------------------------------------
# Parameters / reference
# --------------------------------------------------------------------------

def init_mlp_deep_params(key, h: int, w: int, num_classes: int,
                         hidden_dim: int, num_layers: int,
                         param_dtype=jnp.bfloat16):
    """Deterministic synthetic parameters (shapes match the torch module).

    Weights are stored (in_features, out_features) in bf16; biases stay f32.
    """
    in_dim = 3 * h * w
    dims = [in_dim] + [hidden_dim] * num_layers + [num_classes]
    params = []
    for d_in, d_out in zip(dims[:-1], dims[1:]):
        key, wk, bk = jax.random.split(key, 3)
        scale = 1.0 / jnp.sqrt(jnp.asarray(d_in, dtype=jnp.float32))
        W = jax.random.uniform(wk, (d_in, d_out), jnp.float32, -1.0, 1.0) * scale
        bvec = jax.random.uniform(bk, (1, d_out), jnp.float32, -1.0, 1.0) * scale
        params.append((W.astype(param_dtype), bvec.astype(jnp.float32)))
    return params


def _reference_forward(x, params):
    """Pure-JAX reference emulating bf16 MXU inputs + f32 accumulation."""
    b = x.shape[0]
    h = x.reshape(b, -1)
    n = len(params)
    for i, (W, bias) in enumerate(params):
        acc = jnp.dot(h.astype(W.dtype).astype(jnp.float32),
                      W.astype(jnp.float32),
                      precision=jax.lax.Precision.HIGHEST) + bias
        if i != n - 1:
            acc = jnp.maximum(acc, 0.0)
        h = acc
    return h


if __name__ == "__main__":
    # Small shapes consistent with the module's forward: (b, 3, H, W)
    B, C, H, W = 2, 3, 16, 16
    NUM_CLASSES = 6
    HIDDEN_DIM = 128
    NUM_LAYERS = 4  # number of hidden layers

    key = jax.random.PRNGKey(0)
    key, xk = jax.random.split(key)
    x = jax.random.normal(xk, (B, C, H, W), dtype=jnp.float32)
    params = init_mlp_deep_params(key, H, W, NUM_CLASSES, HIDDEN_DIM, NUM_LAYERS)

    ref = _reference_forward(x, params)

    # Fast (grid-less, single-block) path -- what the default small size takes.
    logits = jax.block_until_ready(fused_mlp_forward(x, params))
    assert logits.shape == (B, NUM_CLASSES), logits.shape
    assert jnp.allclose(logits, ref, atol=1e-3, rtol=1e-3), (
        float(jnp.max(jnp.abs(logits - ref))))

    # K-tiled path (used when 3*H*W is large): force it here with a small tile
    # so the accumulator / pl.when / resident-param path is validated too.
    logits_t = jax.block_until_ready(
        fused_mlp_forward(x, params, force_tiled=True, tk=256))
    assert logits_t.shape == (B, NUM_CLASSES), logits_t.shape
    assert jnp.allclose(logits_t, ref, atol=1e-3, rtol=1e-3), (
        float(jnp.max(jnp.abs(logits_t - ref))))

    print("KERNEL_OK")
</pallas_src>

<mosaic_0001>
module attributes {stable_mosaic.version = 11 : i64} {
  func.func @_mlp_single_block_kernel(%arg0: memref<2x768xbf16, #tpu.memory_space<vmem>>, %arg1: memref<768x128xbf16, #tpu.memory_space<vmem>>, %arg2: memref<1x128xf32, #tpu.memory_space<vmem>>, %arg3: memref<128x128xbf16, #tpu.memory_space<vmem>>, %arg4: memref<1x128xf32, #tpu.memory_space<vmem>>, %arg5: memref<128x128xbf16, #tpu.memory_space<vmem>>, %arg6: memref<1x128xf32, #tpu.memory_space<vmem>>, %arg7: memref<128x128xbf16, #tpu.memory_space<vmem>>, %arg8: memref<1x128xf32, #tpu.memory_space<vmem>>, %arg9: memref<128x128xbf16, #tpu.memory_space<vmem>>, %arg10: memref<1x128xf32, #tpu.memory_space<vmem>>, %arg11: memref<2x128xf32, #tpu.memory_space<vmem>>) attributes {dimension_semantics = [], scalar_prefetch = 0 : i64, scratch_operands = 0 : i64, tpu.core_type = #tpu.core_type<tc>} {
    %c0 = arith.constant 0 : index
    %c0_0 = arith.constant 0 : index
    %0 = vector.load %arg0[%c0, %c0_0] : memref<2x768xbf16, #tpu.memory_space<vmem>>, vector<2x768xbf16>
    %c0_1 = arith.constant 0 : index
    %c0_2 = arith.constant 0 : index
    %1 = vector.load %arg1[%c0_1, %c0_2] : memref<768x128xbf16, #tpu.memory_space<vmem>>, vector<768x128xbf16>
    %cst = arith.constant dense<0.000000e+00> : vector<2x128xf32>
    %2 = tpu.matmul %0, %1, %cst {dimension_numbers = #tpu.dot_dimension_numbers<[1], [0], [0], [1], [0, 0, 1, 1], [], []>} : vector<2x768xbf16>, vector<768x128xbf16>, vector<2x128xf32> -> vector<2x128xf32>
    %c0_3 = arith.constant 0 : index
    %c0_4 = arith.constant 0 : index
    %3 = vector.load %arg2[%c0_3, %c0_4] : memref<1x128xf32, #tpu.memory_space<vmem>>, vector<1x128xf32>
    %4 = vector.broadcast %3 : vector<1x128xf32> to vector<2x128xf32>
    %5 = arith.addf %2, %4 : vector<2x128xf32>
    %cst_5 = arith.constant 0.000000e+00 : f32
    %6 = vector.broadcast %cst_5 : f32 to vector<2x128xf32>
    %7 = arith.maximumf %5, %6 : vector<2x128xf32>
    %8 = arith.truncf %7 : vector<2x128xf32> to vector<2x128xbf16>
    %c0_6 = arith.constant 0 : index
    %c0_7 = arith.constant 0 : index
    %9 = vector.load %arg3[%c0_6, %c0_7] : memref<128x128xbf16, #tpu.memory_space<vmem>>, vector<128x128xbf16>
    %cst_8 = arith.constant dense<0.000000e+00> : vector<2x128xf32>
    %10 = tpu.matmul %8, %9, %cst_8 {dimension_numbers = #tpu.dot_dimension_numbers<[1], [0], [0], [1], [0, 0, 1, 1], [], []>} : vector<2x128xbf16>, vector<128x128xbf16>, vector<2x128xf32> -> vector<2x128xf32>
    %c0_9 = arith.constant 0 : index
    %c0_10 = arith.constant 0 : index
    %11 = vector.load %arg4[%c0_9, %c0_10] : memref<1x128xf32, #tpu.memory_space<vmem>>, vector<1x128xf32>
    %12 = vector.broadcast %11 : vector<1x128xf32> to vector<2x128xf32>
    %13 = arith.addf %10, %12 : vector<2x128xf32>
    %cst_11 = arith.constant 0.000000e+00 : f32
    %14 = vector.broadcast %cst_11 : f32 to vector<2x128xf32>
    %15 = arith.maximumf %13, %14 : vector<2x128xf32>
    %16 = arith.truncf %15 : vector<2x128xf32> to vector<2x128xbf16>
    %c0_12 = arith.constant 0 : index
    %c0_13 = arith.constant 0 : index
    %17 = vector.load %arg5[%c0_12, %c0_13] : memref<128x128xbf16, #tpu.memory_space<vmem>>, vector<128x128xbf16>
    %cst_14 = arith.constant dense<0.000000e+00> : vector<2x128xf32>
    %18 = tpu.matmul %16, %17, %cst_14 {dimension_numbers = #tpu.dot_dimension_numbers<[1], [0], [0], [1], [0, 0, 1, 1], [], []>} : vector<2x128xbf16>, vector<128x128xbf16>, vector<2x128xf32> -> vector<2x128xf32>
    %c0_15 = arith.constant 0 : index
    %c0_16 = arith.constant 0 : index
    %19 = vector.load %arg6[%c0_15, %c0_16] : memref<1x128xf32, #tpu.memory_space<vmem>>, vector<1x128xf32>
    %20 = vector.broadcast %19 : vector<1x128xf32> to vector<2x128xf32>
    %21 = arith.addf %18, %20 : vector<2x128xf32>
    %cst_17 = arith.constant 0.000000e+00 : f32
    %22 = vector.broadcast %cst_17 : f32 to vector<2x128xf32>
    %23 = arith.maximumf %21, %22 : vector<2x128xf32>
    %24 = arith.truncf %23 : vector<2x128xf32> to vector<2x128xbf16>
    %c0_18 = arith.constant 0 : index
    %c0_19 = arith.constant 0 : index
    %25 = vector.load %arg7[%c0_18, %c0_19] : memref<128x128xbf16, #tpu.memory_space<vmem>>, vector<128x128xbf16>
    %cst_20 = arith.constant dense<0.000000e+00> : vector<2x128xf32>
    %26 = tpu.matmul %24, %25, %cst_20 {dimension_numbers = #tpu.dot_dimension_numbers<[1], [0], [0], [1], [0, 0, 1, 1], [], []>} : vector<2x128xbf16>, vector<128x128xbf16>, vector<2x128xf32> -> vector<2x128xf32>
    %c0_21 = arith.constant 0 : index
    %c0_22 = arith.constant 0 : index
    %27 = vector.load %arg8[%c0_21, %c0_22] : memref<1x128xf32, #tpu.memory_space<vmem>>, vector<1x128xf32>
    %28 = vector.broadcast %27 : vector<1x128xf32> to vector<2x128xf32>
    %29 = arith.addf %26, %28 : vector<2x128xf32>
    %cst_23 = arith.constant 0.000000e+00 : f32
    %30 = vector.broadcast %cst_23 : f32 to vector<2x128xf32>
    %31 = arith.maximumf %29, %30 : vector<2x128xf32>
    %32 = arith.truncf %31 : vector<2x128xf32> to vector<2x128xbf16>
    %c0_24 = arith.constant 0 : index
    %c0_25 = arith.constant 0 : index
    %33 = vector.load %arg9[%c0_24, %c0_25] : memref<128x128xbf16, #tpu.memory_space<vmem>>, vector<128x128xbf16>
    %cst_26 = arith.constant dense<0.000000e+00> : vector<2x128xf32>
    %34 = tpu.matmul %32, %33, %cst_26 {dimension_numbers = #tpu.dot_dimension_numbers<[1], [0], [0], [1], [0, 0, 1, 1], [], []>} : vector<2x128xbf16>, vector<128x128xbf16>, vector<2x128xf32> -> vector<2x128xf32>
    %c0_27 = arith.constant 0 : index
    %c0_28 = arith.constant 0 : index
    %35 = vector.load %arg10[%c0_27, %c0_28] : memref<1x128xf32, #tpu.memory_space<vmem>>, vector<1x128xf32>
    %36 = vector.broadcast %35 : vector<1x128xf32> to vector<2x128xf32>
    %37 = arith.addf %34, %36 : vector<2x128xf32>
    %c0_29 = arith.constant 0 : index
    %c0_30 = arith.constant 0 : index
    %38 = vector.load %arg11[%c0_29, %c0_30] : memref<2x128xf32, #tpu.memory_space<vmem>>, vector<2x128xf32>
    tpu.vector_store %arg11[%c0_29, %c0_30], %37 {strides = array<i32>} : memref<2x128xf32, #tpu.memory_space<vmem>>, vector<2x128xf32>,
    return
  }
}

</mosaic_0001>

<bundles_post_ra>
// kernel: tpu_custom_call.1
= control target key start
LH: loop header
LB: loop body
LE: loop exit
PB: predicated region body
PF: predicated region fallthrough
CT: control target
= control target key end

     0   :  { %16 = vsyncpa [#allocation3], 0  ;;  %s1677_s0 = inlined_call_operand.hbm [shape: bf16[2,768], index: 0, kind: input, shape index: {}]   ;;  %s1678_s1 = inlined_call_operand.hbm [shape: bf16[768,128], index: 1, kind: input, shape index: {}]   ;;  %s1679_s2 = inlined_call_operand.vmem [shape: f32[1,128], index: 2, kind: input, shape index: {}]   ;;  %s1680_s3 = inlined_call_operand.hbm [shape: bf16[128,128], index: 3, kind: input, shape index: {}]   ;;  %s1681_s4 = inlined_call_operand.vmem [shape: f32[1,128], index: 4, kind: input, shape index: {}]   ;;  %s1682_s5 = inlined_call_operand.hbm [shape: bf16[128,128], index: 5, kind: input, shape index: {}]   ;;  %s1683_s6 = inlined_call_operand.vmem [shape: f32[1,128], index: 6, kind: input, shape index: {}]   ;;  %s1684_s7 = inlined_call_operand.hbm [shape: bf16[128,128], index: 7, kind: input, shape index: {}]   ;;  %s1685_s8 = inlined_call_operand.vmem [shape: f32[1,128], index: 8, kind: input, shape index: {}]   ;;  %s1686_s9 = inlined_call_operand.hbm [shape: bf16[128,128], index: 9, kind: input, shape index: {}]   ;;  %s1687_s10 = inlined_call_operand.vmem [shape: f32[1,128], index: 10, kind: input, shape index: {}]   ;;  %s1688_s11 = inlined_call_operand.hbm [shape: f32[2,128], index: 11, kind: output, shape index: {}]  }
   0x1   :  { %17 = vsyncpa [#allocation6], 0 }
   0x2   :  { %18 = vsyncpa [#allocation9], 0 }
   0x3   :  { %19 = vsyncpa [#allocation12], 0  ;;  %s36_s19 = sshll.u32 %s1678_s1, 4  ;;  %s37_s19 = int_to_ptr.hbm [resolvable:$true] %s36_s19 }
   0x4   :  { %20 = vsyncpa [#allocation4], 0  ;;  %s1557_s20 = smov [#allocation5]   ;;  %s66_s24 = sshll.u32 %s1682_s5, 4  ;;  %s67_s24 = int_to_ptr.hbm [resolvable:$true] %s66_s24 }
   0x5   :  { %s38_s21 = sshll.u32 %s1557_s20, 4  ;;  %s1558_s25 = smov 64   ;;  %s39_s21 = int_to_ptr.vmem [resolvable:$true] %s38_s21 }
   0x6   :  { %s1559_s26 = smov 4   ;;  %s1560_s27 = smov [#allocation8]  }
   0x7   :  { %44 = dma.hbm_to_vmem [thread:$0]  %s37_s19, 6144, %s39_s21, [#allocation6], %s1558_s25, %s1558_s25, %s1559_s26  }
   0x8   :  { %s68_s28 = sshll.u32 %s1560_s27, 4  ;;  %s26_s30 = sshll.u32 %s1677_s0, 4  ;;  %s69_s28 = int_to_ptr.vmem [resolvable:$true] %s68_s28  ;;  %s27_s30 = int_to_ptr.hbm [resolvable:$true] %s26_s30 }
   0x9   :  { %74 = dma.hbm_to_vmem [thread:$0]  %s67_s24, 1024, %s69_s28, [#allocation9], %s1558_s25, %s1558_s25, %s1559_s26  }
   0xa   :  { %s51_s13 = sshll.u32 %s1680_s3, 4  ;;  %s1561_s14 = smov [#allocation2]   ;;  %s52_s13 = int_to_ptr.hbm [resolvable:$true] %s51_s13 }
   0xb   :  { %s28_s15 = sshll.u32 %s1561_s14, 4  ;;  %s1562_s16 = smov [#allocation7]   ;;  %s29_s15 = int_to_ptr.vmem [resolvable:$true] %s28_s15 }
   0xc   :  { %31 = dma.hbm_to_vmem [thread:$0]  %s27_s30, 96, %s29_s15, [#allocation3]  }
   0xd   :  { %s53_s17 = sshll.u32 %s1562_s16, 4  ;;  %s81_s0 = sshll.u32 %s1684_s7, 4  ;;  %s54_s17 = int_to_ptr.vmem [resolvable:$true] %s53_s17  ;;  %s82_s0 = int_to_ptr.hbm [resolvable:$true] %s81_s0 }
   0xe   :  { %59 = dma.hbm_to_vmem [thread:$0]  %s52_s13, 1024, %s54_s17, [#allocation6], %s1558_s25, %s1558_s25, %s1559_s26  }
   0xf   :  { %s96_s3 = sshll.u32 %s1686_s9, 4  ;;  %s1563_s22 = smov [#allocation10]   ;;  %s97_s3 = int_to_ptr.hbm [resolvable:$true] %s96_s3 }
  0x10   :  { %s83_s23 = sshll.u32 %s1563_s22, 4  ;;  %s1564_s24 = smov [#allocation11]   ;;  %s84_s23 = int_to_ptr.vmem [resolvable:$true] %s83_s23 }
  0x11   :  { %89 = dma.hbm_to_vmem [thread:$0]  %s82_s0, 1024, %s84_s23, [#allocation9], %s1558_s25, %s1558_s25, %s1559_s26  }
  0x12   :  { %s98_s7 = sshll.u32 %s1564_s24, 4  ;;  %s99_s7 = int_to_ptr.vmem [resolvable:$true] %s98_s7 }
  0x13   :  { %104 = dma.hbm_to_vmem [thread:$0]  %s97_s3, 1024, %s99_s7, [#allocation12], %s1558_s25, %s1558_s25, %s1559_s26  }
  0x14   :  { %1547 = dma.done.wait [#allocation3], 96  }
  0x15   :  { %1548 = vsyncadd [#allocation3], 4294967200 }
  0x16   :  { %1549 = dma.done.wait [#allocation6], 7168  }
  0x17   :  { %1550 = vsyncadd [#allocation6], 4294960128 }
  0x18   :  { %1551 = dma.done.wait [#allocation9], 2048  }
  0x19   :  { %1552 = vsyncadd [#allocation9], 4294965248 }
  0x1a   :  { %1553 = dma.done.wait [#allocation12], 1024  }
  0x1b   :  { %1554 = vsyncadd [#allocation12], 4294966272  ;;  %v1292_v0 = vld [vmem:[#allocation5 + $0x38] sm:$0xff]  ;;  %v1291_v2 = vld [vmem:[#allocation5 + $0x30] sm:$0xff]  ;;  %s1565_s30 = smov [#allocation13]   ;;  %s952_s14 = sshll.u32 %s1688_s11, 4  ;;  %s953_s14 = int_to_ptr.hbm [resolvable:$true] %s952_s14 }
  0x1c   :  { %v1300_v1 = vld [vmem:[#allocation5 + $0x78] sm:$0xff]  ;;  %534 = vmatpush.bf16.msra.mxu0 %v1292_v0  ;;  %v1299_v3 = vld [vmem:[#allocation5 + $0x70] sm:$0xff]  ;;  %v1290_v8 = vld [vmem:[#allocation5 + $0x28] sm:$0xff]  ;;  %s950_s5 = sshll.u32 %s1565_s30, 4  ;;  %s951_s5 = int_to_ptr.vmem [resolvable:$true] %s950_s5 }
  0x1d   :  { %547 = vmatpush.bf16.msra.mxu1 %v1300_v1  ;;  %v1308_v4 = vld [vmem:[#allocation5 + $0xb8] sm:$0xff]  ;;  %v1307_v6 = vld [vmem:[#allocation5 + $0xb0] sm:$0xff]  ;;  %v1298_v9 = vld [vmem:[#allocation5 + $0x68] sm:$0xff] }
  0x1e   :  { %v1316_v5 = vld [vmem:[#allocation5 + $0xf8] sm:$0xff]  ;;  %560 = vmatpush.bf16.msra.mxu2 %v1308_v4  ;;  %v1315_v7 = vld [vmem:[#allocation5 + $0xf0] sm:$0xff]  ;;  %v1306_v10 = vld [vmem:[#allocation5 + $0xa8] sm:$0xff] }
  0x1f   :  { %573 = vmatpush.bf16.msra.mxu3 %v1316_v5  ;;  %v1314_v11 = vld [vmem:[#allocation5 + $0xe8] sm:$0xff]  ;;  %v1289_v12 = vld [vmem:[#allocation5 + $0x20] sm:$0xff]  ;;  %v131_v14 = vld [vmem:[#allocation2] sm:$0x3f] }
  0x20   :  { %535 = vmatpush.bf16.msra.mxu0 %v1291_v2  ;;  %v1297_v13 = vld [vmem:[#allocation5 + $0x60] sm:$0xff]  ;;  %233 = vst [vmem:[#allocation1] ss:$9 sm:$0xff] %v131_v14  ;;  %v1288_v16 = vld [vmem:[#allocation5 + $0x18] sm:$0xff]  ;;  %v1287_v21 = vld [vmem:[#allocation5 + $0x10] sm:$0xff] }
  0x21   :  { %548 = vmatpush.bf16.msra.mxu1 %v1299_v3  ;;  %v1305_v15 = vld [vmem:[#allocation5 + $0xa0] sm:$0xff]  ;;  %v1296_v18 = vld [vmem:[#allocation5 + $0x58] sm:$0xff]  ;;  %v1295_v22 = vld [vmem:[#allocation5 + $0x50] sm:$0xff] }
  0x22   :  { %561 = vmatpush.bf16.msra.mxu2 %v1307_v6  ;;  %v1313_v17 = vld [vmem:[#allocation5 + $0xe0] sm:$0xff]  ;;  %v1304_v19 = vld [vmem:[#allocation5 + $0x98] sm:$0xff]  ;;  %v1303_v23 = vld [vmem:[#allocation5 + $0x90] sm:$0xff] }
  0x23   :  { %574 = vmatpush.bf16.msra.mxu3 %v1315_v7  ;;  %v1312_v20 = vld [vmem:[#allocation5 + $0xd8] sm:$0xff]  ;;  %v1311_v24 = vld [vmem:[#allocation5 + $0xd0] sm:$0xff]  ;;  %v1286_v25 = vld [vmem:[#allocation5 + $0x8] sm:$0xff] }
  0x24   :  { %536 = vmatpush.bf16.msra.mxu0 %v1290_v8  ;;  %v1294_v26 = vld [vmem:[#allocation5 + $0x48] sm:$0xff]  ;;  %v1285_v29 = vld [vmem:[#allocation5] sm:$0xff]  ;;  %v1324_v31 = vld [vmem:[#allocation5 + $0x138] sm:$0xff] }
  0x25   :  { %549 = vmatpush.bf16.msra.mxu1 %v1298_v9  ;;  %v1302_v27 = vld [vmem:[#allocation5 + $0x88] sm:$0xff]  ;;  %v1293_v30 = vld [vmem:[#allocation5 + $0x40] sm:$0xff]  ;;  %v1332_v32 = vld [vmem:[#allocation5 + $0x178] sm:$0xff] }
  0x26   :  { %562 = vmatpush.bf16.msra.mxu2 %v1306_v10  ;;  %v1310_v28 = vld [vmem:[#allocation5 + $0xc8] sm:$0xff]  ;;  %v1301_v33 = vld [vmem:[#allocation5 + $0x80] sm:$0xff]  ;;  %v1323_v37 = vld [vmem:[#allocation5 + $0x130] sm:$0xff] }
  0x27   :  { %575 = vmatpush.bf16.msra.mxu3 %v1314_v11  ;;  %v234_v34 = vld [vmem:[#allocation1] sm:$0xff]  ;;  %v235_v35 = vld [vmem:[#allocation1 + $0x9] sm:$0xff]  ;;  %v236_v39 = vld [vmem:[#allocation1 + $0x12] sm:$0xff] }
  0x28   :  { %537 = vmatpush.bf16.msra.mxu0 %v1289_v12  ;;  %v1309_v36 = vld [vmem:[#allocation5 + $0xc0] sm:$0xff]  ;;  %v1331_v38 = vld [vmem:[#allocation5 + $0x170] sm:$0xff]  ;;  %v1322_v41 = vld [vmem:[#allocation5 + $0x128] sm:$0xff] }
  0x29   :  { %550 = vmatpush.bf16.msra.mxu1 %v1297_v13  ;;  %v237_v40 = vld [vmem:[#allocation1 + $0x1b] sm:$0xff]  ;;  %v1321_v43 = vld [vmem:[#allocation5 + $0x120] sm:$0xff]  ;;  %v1320_v45 = vld [vmem:[#allocation5 + $0x118] sm:$0xff] }
  0x2a   :  { %563 = vmatpush.bf16.msra.mxu2 %v1305_v15  ;;  %v1330_v42 = vld [vmem:[#allocation5 + $0x168] sm:$0xff]  ;;  %v1329_v44 = vld [vmem:[#allocation5 + $0x160] sm:$0xff]  ;;  %v1328_v46 = vld [vmem:[#allocation5 + $0x158] sm:$0xff] }
  0x2b   :  { %576 = vmatpush.bf16.msra.mxu3 %v1313_v17  ;;  %v1319_v47 = vld [vmem:[#allocation5 + $0x110] sm:$0xff]  ;;  %v1318_v49 = vld [vmem:[#allocation5 + $0x108] sm:$0xff]  ;;  %v1317_v51 = vld [vmem:[#allocation5 + $0x100] sm:$0xff] }
  0x2c   :  { %538 = vmatpush.bf16.msra.mxu0 %v1288_v16  ;;  %v1327_v48 = vld [vmem:[#allocation5 + $0x150] sm:$0xff]  ;;  %v1326_v50 = vld [vmem:[#allocation5 + $0x148] sm:$0xff]  ;;  %v1325_v52 = vld [vmem:[#allocation5 + $0x140] sm:$0xff] }
  0x2d   :  { %551 = vmatpush.bf16.msra.mxu1 %v1296_v18  ;;  %v238_v53 = vld [vmem:[#allocation1 + $0x24] sm:$0xff]  ;;  %v239_v54 = vld [vmem:[#allocation1 + $0x2d] sm:$0xff]  ;;  %v1338_v57 = vld [vmem:[#allocation7 + $0x28] sm:$0xff] }
  0x2e   :  { %564 = vmatpush.bf16.msra.mxu2 %v1304_v19  ;;  %v1340_v55 = vld [vmem:[#allocation7 + $0x38] sm:$0xff]  ;;  %v1339_v56 = vld [vmem:[#allocation7 + $0x30] sm:$0xff]  ;;  %v1337_v58 = vld [vmem:[#allocation7 + $0x20] sm:$0xff] }
  0x2f   :  { %577 = vmatpush.bf16.msra.mxu3 %v1312_v20  ;;  %v1336_v59 = vld [vmem:[#allocation7 + $0x18] sm:$0xff]  ;;  %v1335_v60 = vld [vmem:[#allocation7 + $0x10] sm:$0xff]  ;;  %v1334_v61 = vld [vmem:[#allocation7 + $0x8] sm:$0xff] }
  0x30   :  { %539 = vmatpush.bf16.msra.mxu0 %v1287_v21  ;;  %v1333_v0 = vld [vmem:[#allocation7] sm:$0xff]  ;;  %v1348_v1 = vld [vmem:[#allocation8 + $0x38] sm:$0xff]  ;;  %v1347_v4 = vld [vmem:[#allocation8 + $0x30] sm:$0xff] }
  0x31   :  { %552 = vmatpush.bf16.msra.mxu1 %v1295_v22  ;;  %v1374_v7 = vld [vmem:[%s1679_s2] ss:$0 sm:$0xff]  ;;  %v1346_v8 = vld [vmem:[#allocation8 + $0x28] sm:$0xff]  ;;  %v1345_v10 = vld [vmem:[#allocation8 + $0x20] sm:$0xff] }
  0x32   :  { %565 = vmatpush.bf16.msra.mxu2 %v1303_v23  ;;  %v1344_v14 = vld [vmem:[#allocation8 + $0x18] sm:$0xff]  ;;  %v1343_v16 = vld [vmem:[#allocation8 + $0x10] sm:$0xff] }
  0x33   :  { %578 = vmatpush.bf16.msra.mxu3 %v1311_v24 }
  0x34   :  { %540 = vmatpush.bf16.msra.mxu0 %v1286_v25 }
  0x35   :  { %553 = vmatpush.bf16.msra.mxu1 %v1294_v26  ;;  %v1342_v26 = vld [vmem:[#allocation8 + $0x8] sm:$0xff] }
  0x36   :  { %566 = vmatpush.bf16.msra.mxu2 %v1302_v27  ;;  %v1341_v27 = vld [vmem:[#allocation8] sm:$0xff] }
  0x37   :  { %579 = vmatpush.bf16.msra.mxu3 %v1310_v28  ;;  %v1356_v28 = vld [vmem:[#allocation10 + $0x38] sm:$0xff] }
  0x38   :  { %541 = vmatpush.bf16.msra.mxu0 %v1285_v29  ;;  %v1355_v29 = vld [vmem:[#allocation10 + $0x30] sm:$0xff] }
  0x39   :  { %554 = vmatpush.bf16.msra.mxu1 %v1293_v30  ;;  %v1354_v30 = vld [vmem:[#allocation10 + $0x28] sm:$0xff] }
  0x3a   :  { %567 = vmatpush.bf16.msra.mxu2 %v1301_v33  ;;  %v1351_v33 = vld [vmem:[#allocation10 + $0x10] sm:$0xff] }
  0x3b   :  { %542 = vmatmul.bf16.vlgmr.msra.gmra.mxu0 %v234_v34  ;;  %580 = vmatpush.bf16.msra.mxu3 %v1309_v36  ;;  %v1375_v34 = vld [vmem:[%s1681_s4] ss:$0 sm:$0xff] }
  0x3c   :  { %586 = vmatpush.bf16.msrb.mxu0 %v1324_v31  ;;  %555 = vmatmul.bf16.vlgmr.msra.gmra.mxu1 %v235_v35  ;;  %v1353_v31 = vld [vmem:[#allocation10 + $0x20] sm:$0xff] }
  0x3d   :  { %599 = vmatpush.bf16.msrb.mxu1 %v1332_v32  ;;  %568 = vmatmul.bf16.vlgmr.msra.gmra.mxu2 %v236_v39  ;;  %v1352_v32 = vld [vmem:[#allocation10 + $0x18] sm:$0xff] }
  0x3e   :  { %581 = vmatmul.bf16.vlgmr.msra.gmra.mxu3 %v237_v40  ;;  %682 = vmatpush.bf16.msrb.mxu2 %v1340_v55  ;;  %v1350_v40 = vld [vmem:[#allocation10 + $0x8] sm:$0xff]  ;;  %v1357_v55 = vld [vmem:[#allocation11] sm:$0xff] }
  0x3f   :  { %765 = vmatpush.bf16.msrb.mxu3 %v1348_v1 }
  0x40   :  { %587 = vmatpush.bf16.msrb.mxu0 %v1323_v37 }
  0x41   :  { %600 = vmatpush.bf16.msrb.mxu1 %v1331_v38 }
  0x42   :  { %683 = vmatpush.bf16.msrb.mxu2 %v1339_v56  ;;  %v1377_v56 = vld [vmem:[%s1685_s8] ss:$0 sm:$0xff] }
  0x43   :  { %766 = vmatpush.bf16.msrb.mxu3 %v1347_v4 }
  0x44   :  { %588 = vmatpush.bf16.msrb.mxu0 %v1322_v41  ;;  %v1349_v41 = vld [vmem:[#allocation10] sm:$0xff] }
  0x45   :  { %601 = vmatpush.bf16.msrb.mxu1 %v1330_v42  ;;  %v1364_v42 = vld [vmem:[#allocation11 + $0x38] sm:$0xff] }
  0x46   :  { %684 = vmatpush.bf16.msrb.mxu2 %v1338_v57 }
  0x47   :  { %767 = vmatpush.bf16.msrb.mxu3 %v1346_v8 }
  0x48   :  { %589 = vmatpush.bf16.msrb.mxu0 %v1321_v43  ;;  %v1363_v43 = vld [vmem:[#allocation11 + $0x30] sm:$0xff] }
  0x49   :  { %602 = vmatpush.bf16.msrb.mxu1 %v1329_v44  ;;  %v1362_v44 = vld [vmem:[#allocation11 + $0x28] sm:$0xff] }
  0x4a   :  { %685 = vmatpush.bf16.msrb.mxu2 %v1337_v58 }
  0x4b   :  { %768 = vmatpush.bf16.msrb.mxu3 %v1345_v10 }
  0x4c   :  { %590 = vmatpush.bf16.msrb.mxu0 %v1320_v45  ;;  %v1361_v45 = vld [vmem:[#allocation11 + $0x20] sm:$0xff] }
  0x4d   :  { %603 = vmatpush.bf16.msrb.mxu1 %v1328_v46  ;;  %v1360_v46 = vld [vmem:[#allocation11 + $0x18] sm:$0xff] }
  0x4e   :  { %686 = vmatpush.bf16.msrb.mxu2 %v1336_v59 }
  0x4f   :  { %769 = vmatpush.bf16.msrb.mxu3 %v1344_v14 }
  0x50   :  { %591 = vmatpush.bf16.msrb.mxu0 %v1319_v47  ;;  %v1359_v47 = vld [vmem:[#allocation11 + $0x10] sm:$0xff] }
  0x51   :  { %604 = vmatpush.bf16.msrb.mxu1 %v1327_v48  ;;  %v1376_v48 = vld [vmem:[%s1683_s6] ss:$0 sm:$0xff] }
  0x52   :  { %687 = vmatpush.bf16.msrb.mxu2 %v1335_v60 }
  0x53   :  { %770 = vmatpush.bf16.msrb.mxu3 %v1343_v16 }
  0x54   :  { %592 = vmatpush.bf16.msrb.mxu0 %v1318_v49 }
  0x55   :  { %605 = vmatpush.bf16.msrb.mxu1 %v1326_v50 }
  0x56   :  { %688 = vmatpush.bf16.msrb.mxu2 %v1334_v61 }
  0x57   :  { %771 = vmatpush.bf16.msrb.mxu3 %v1342_v26 }
  0x58   :  { %593 = vmatpush.bf16.msrb.mxu0 %v1317_v51 }
  0x59   :  { %606 = vmatpush.bf16.msrb.mxu1 %v1325_v52 }
  0x5a   :  { %689 = vmatpush.bf16.msrb.mxu2 %v1333_v0 }
  0x5b   :  { %594 = vmatmul.bf16.vlgmr.msrb.gmra.mxu0 %v238_v53  ;;  %772 = vmatpush.bf16.msrb.mxu3 %v1341_v27 }
  0x5c   :  { %607 = vmatmul.bf16.vlgmr.msrb.gmra.mxu1 %v239_v54  ;;  %848 = vmatpush.bf16.msra.mxu0 %v1356_v28  ;;  %v1358_v54 = vld [vmem:[#allocation11 + $0x8] sm:$0xff] }
  0x5d   :  { %931 = vmatpush.bf16.msra.mxu1 %v1364_v42 }
  0x60   :  { %849 = vmatpush.bf16.msra.mxu0 %v1355_v29 }
  0x61   :  { %932 = vmatpush.bf16.msra.mxu1 %v1363_v43 }
  0x64   :  { %850 = vmatpush.bf16.msra.mxu0 %v1354_v30 }
  0x65   :  { %933 = vmatpush.bf16.msra.mxu1 %v1362_v44 }
  0x68   :  { %851 = vmatpush.bf16.msra.mxu0 %v1353_v31 }
  0x69   :  { %934 = vmatpush.bf16.msra.mxu1 %v1361_v45 }
  0x6c   :  { %852 = vmatpush.bf16.msra.mxu0 %v1352_v32 }
  0x6d   :  { %935 = vmatpush.bf16.msra.mxu1 %v1360_v46 }
  0x70   :  { %853 = vmatpush.bf16.msra.mxu0 %v1351_v33 }
  0x71   :  { %936 = vmatpush.bf16.msra.mxu1 %v1359_v47 }
  0x74   :  { %854 = vmatpush.bf16.msra.mxu0 %v1350_v40 }
  0x75   :  { %937 = vmatpush.bf16.msra.mxu1 %v1358_v54 }
  0x78   :  { %855 = vmatpush.bf16.msra.mxu0 %v1349_v41 }
  0x79   :  { %938 = vmatpush.bf16.msra.mxu1 %v1357_v55 }
  0xb8   :  { %v543_v62 = vpop.f32.mrf.mxu0 }
  0xb9   :  { %v556_v63 = vpop.f32.mrf.mxu1  ;;  %v544_v9 = vadd.f32 %v1374_v7, %v543_v62  ;;  %v1378_v62 = vld [vmem:[%s1687_s10] ss:$0 sm:$0xff] }
  0xbb   :  { %v557_v13 = vadd.f32 %v556_v63, %v544_v9 }
  0xc0   :  { %v545_v2 = vpop.f32.mrf.mxu0  ;;  %v569_v5 = vpop.f32.mrf.mxu2 }
  0xc1   :  { %v558_v3 = vpop.f32.mrf.mxu1  ;;  %v582_v6 = vpop.f32.mrf.mxu3  ;;  %v570_v15 = vadd.f32 %v569_v5, %v557_v13 }
  0xc3   :  { %v583_v17 = vadd.f32 %v582_v6, %v570_v15 }
  0xc8   :  { %v571_v11 = vpop.f32.mrf.mxu2 }
  0xc9   :  { %v584_v12 = vpop.f32.mrf.mxu3 }
  0xd8   :  { %v595_v18 = vpop.f32.mrf.mxu0 }
  0xd9   :  { %v608_v19 = vpop.f32.mrf.mxu1  ;;  %v596_v20 = vadd.f32 %v595_v18, %v583_v17 }
  0xdb   :  { %v609_v21 = vadd.f32 %v608_v19, %v596_v20 }
  0xdd   :  { %v612_v22 = vmax.f32 %v609_v21, 0.0 }
  0xdf   :  { %v613_v23 = vpack.c.bf16 %v612_v22, %v612_v22 }
  0xe0   :  { %v597_v24 = vpop.f32.mrf.mxu0 }
  0xe1   :  { %v610_v25 = vpop.f32.mrf.mxu1  ;;  %690 = vmatmul.bf16.vlgmr.msrb.gmra.mxu2 %v613_v23 }
 0x164   :  { %v691_v35 = vpop.f32.mrf.mxu2 }
 0x165   :  { %v692_v36 = vadd.f32 %v1375_v34, %v691_v35 }
 0x167   :  { %v695_v37 = vmax.f32 %v692_v36, 0.0 }
 0x169   :  { %v696_v38 = vpack.c.bf16 %v695_v37, %v695_v37 }
 0x16b   :  { %773 = vmatmul.bf16.vlgmr.msrb.gmra.mxu3 %v696_v38 }
 0x16c   :  { %v693_v39 = vpop.f32.mrf.mxu2 }
 0x1ee   :  { %v774_v49 = vpop.f32.mrf.mxu3 }
 0x1ef   :  { %v775_v50 = vadd.f32 %v1376_v48, %v774_v49 }
 0x1f1   :  { %v778_v51 = vmax.f32 %v775_v50, 0.0 }
 0x1f3   :  { %v779_v52 = vpack.c.bf16 %v778_v51, %v778_v51 }
 0x1f5   :  { %856 = vmatmul.bf16.vlgmr.msra.gmra.mxu0 %v779_v52 }
 0x1f6   :  { %v776_v53 = vpop.f32.mrf.mxu3 }
 0x272   :  { %v857_v57 = vpop.f32.mrf.mxu0 }
 0x273   :  { %v858_v58 = vadd.f32 %v1377_v56, %v857_v57 }
 0x275   :  { %v861_v59 = vmax.f32 %v858_v58, 0.0 }
 0x277   :  { %v862_v60 = vpack.c.bf16 %v861_v59, %v861_v59 }
 0x279   :  { %939 = vmatmul.bf16.vlgmr.msra.gmra.mxu1 %v862_v60 }
 0x27a   :  { %v859_v61 = vpop.f32.mrf.mxu0 }
 0x2f6   :  { %v940_v63 = vpop.f32.mrf.mxu1 }
 0x2f7   :  { %v941_v0 = vadd.f32 %v1378_v62, %v940_v63 }
 0x2f9   :  { %944 = vst [vmem:[#allocation13] sm:$0x3] %v941_v0 }
 0x2fa   :  { %955 = dma.vmem_to_hbm [thread:$0]  %s951_s5, 32, %s953_s14, [#allocation4]  }
 0x2fe   :  { %v942_v1 = vpop.f32.mrf.mxu1 }
 0x2ff   :  { %1555 = dma.done.wait [#allocation4], 32  }
 0x300   :  { %1556 = vsyncadd [#allocation4], 4294967264 }
 0x301   :  { %960 = vsyncpa [#allocation3], 1 }
 0x302   :  { %961 = vsyncpa [#allocation6], 1 }
 0x303   :  { %962 = vsyncpa [#allocation9], 1 }
 0x304   :  { %963 = vsyncpa [#allocation12], 1 }
 0x305   :  { %964 = vsyncpa [#allocation4], 1 }

</bundles_post_ra>
